<compile_context>
chip_gen: v6e
topology: v6e:2x2x1
jax: 0.10.0
libtpu: 0.0.40
codegen_flags: <defaults>
</compile_context>

<pallas_src>
import functools

import jax
import jax.numpy as jnp
from jax.experimental import pallas as pl
from jax.experimental.pallas import tpu as pltpu

# Problem sizes (small, consistent with the XOR-RNN module).
SEQ_LEN = 8
BATCH = 4
DIM_IN = 2
DIM_HIDDEN = 32
DIM_OUT = 1

BATCH_PAD = 8  # pad batch to one sublane tile so per-step slices are aligned


def rnn_kernel(xflat_ref, w1x_ref, w1h_ref, b1_ref, w2_ref, b2_ref, out_ref,
               *, seq_len, batch_pad):
    """Full RNN forward in one kernel invocation.

    xflat_ref : (T*Bp, Din)  -- row t*Bp + b == xs_padded[t, b]
    w1x_ref   : (Din, H)
    w1h_ref   : (H, H)
    b1_ref    : (1, H)
    w2_ref    : (1, H)       -- W2 transposed to a lane-dense row
    b2_ref    : (1, 1)
    out_ref   : (Bp, 1)      -- final h_T @ W2 + b2 (padded batch rows)
    """
    hidden = w1h_ref.shape[1]
    din = xflat_ref.shape[1]

    # --- Input projection on the VPU (K = Din = 2): two broadcast FMAs.
    # Avoids a tiny K=2 MXU push whose MRF drain would sit in front of the
    # first recurrence pop (v5e/v6e).
    xflat = xflat_ref[...]
    x_proj = b1_ref[...]                                   # (1, H) -> broadcast
    for d in range(din):
        x_proj = x_proj + xflat[:, d:d + 1] * w1x_ref[d:d + 1, :]
    # x_proj: (T*Bp, H)

    # --- Serial recurrence: one (Bp, H) @ (H, H) MXU dot + tanh (EUP) per
    # step.  Slices t*Bp:(t+1)*Bp are sublane-tile aligned (Bp == 8).
    w1h = w1h_ref[...]
    h = jnp.zeros((batch_pad, hidden), jnp.float32)
    for t in range(seq_len):
        x_t = x_proj[t * batch_pad:(t + 1) * batch_pad, :]  # static, aligned
        h = jnp.tanh(x_t + jnp.dot(h, w1h, preferred_element_type=jnp.float32))

    # --- Output projection fused in as VPU multiply + lane reduce (XLU);
    # no N=1 MXU push and no extra XLA op / HBM round-trip for h_T.
    out_ref[...] = jnp.sum(h * w2_ref[...], axis=-1, keepdims=True) + b2_ref[...]


@jax.jit
def rnn_forward(xs, w1x, w1h, b1, w2, b2):
    """xs: [T, B, D_in] f32 -> [B, D_out] f32."""
    T, B, Din = xs.shape
    H = w1x.shape[1]
    Bp = BATCH_PAD

    # Pad batch to a full sublane tile; padded rows evolve independently and
    # are sliced off at the end, so they cannot affect the real rows.
    xs_pad = jnp.zeros((T, Bp, Din), xs.dtype).at[:, :B, :].set(xs)
    xs_flat = xs_pad.reshape(T * Bp, Din)       # row t*Bp + b == xs_pad[t, b]

    vmem_spec = pl.BlockSpec(memory_space=pltpu.MemorySpace.VMEM)

    out_pad = pl.pallas_call(
        functools.partial(rnn_kernel, seq_len=T, batch_pad=Bp),
        out_shape=jax.ShapeDtypeStruct((Bp, DIM_OUT), jnp.float32),
        in_specs=[vmem_spec] * 6,
        out_specs=vmem_spec,
    )(
        xs_flat,
        w1x,
        w1h,
        b1.reshape(1, H),
        w2.reshape(DIM_OUT, H),   # (H, 1) -> lane-dense (1, H) row
        b2.reshape(1, 1),
    )
    return out_pad[:B]


def reference_forward(xs, w1x, w1h, b1, w2, b2):
    """Plain-JAX reference mirroring the PyTorch forward."""
    h = jnp.zeros((xs.shape[1], w1x.shape[1]), jnp.float32)
    for t in range(xs.shape[0]):
        h = jnp.tanh(xs[t] @ w1x + h @ w1h + b1)
    return h @ w2 + b2


def init_params(key):
    k1, k2, k3 = jax.random.split(key, 3)
    w1x = 0.1 * jax.random.normal(k1, (DIM_IN, DIM_HIDDEN), jnp.float32)
    # get_rand_orth: QR of a random normal matrix -> orthogonal W1h
    temp = jax.random.normal(k2, (DIM_HIDDEN, DIM_HIDDEN), jnp.float32)
    q, _ = jnp.linalg.qr(temp)
    w1h = q.astype(jnp.float32)
    b1 = jnp.zeros((DIM_HIDDEN,), jnp.float32)
    w2 = 0.1 * jax.random.normal(k3, (DIM_HIDDEN, DIM_OUT), jnp.float32)
    b2 = jnp.zeros((), jnp.float32)
    return w1x, w1h, b1, w2, b2


if __name__ == "__main__":
    key = jax.random.PRNGKey(0)
    k_params, k_x = jax.random.split(key)

    w1x, w1h, b1, w2, b2 = init_params(k_params)
    xs = jax.random.normal(k_x, (SEQ_LEN, BATCH, DIM_IN), jnp.float32)

    out = rnn_forward(xs, w1x, w1h, b1, w2, b2)
    out = jax.block_until_ready(out)

    ref = reference_forward(xs, w1x, w1h, b1, w2, b2)
    assert out.shape == (BATCH, DIM_OUT), out.shape
    assert jnp.allclose(out, ref, atol=1e-5, rtol=1e-5), (out, ref)

    print("KERNEL_OK")
</pallas_src>

<mosaic_0001>
module attributes {stable_mosaic.version = 11 : i64} {
  func.func @rnn_kernel(%arg0: memref<64x2xf32, #tpu.memory_space<vmem>>, %arg1: memref<2x32xf32, #tpu.memory_space<vmem>>, %arg2: memref<32x32xf32, #tpu.memory_space<vmem>>, %arg3: memref<1x32xf32, #tpu.memory_space<vmem>>, %arg4: memref<1x32xf32, #tpu.memory_space<vmem>>, %arg5: memref<1x1xf32, #tpu.memory_space<vmem>>, %arg6: memref<8x1xf32, #tpu.memory_space<vmem>>) attributes {dimension_semantics = [], scalar_prefetch = 0 : i64, scratch_operands = 0 : i64, tpu.core_type = #tpu.core_type<tc>} {
    %c0 = arith.constant 0 : index
    %c0_0 = arith.constant 0 : index
    %0 = vector.load %arg0[%c0, %c0_0] : memref<64x2xf32, #tpu.memory_space<vmem>>, vector<64x2xf32>
    %c0_1 = arith.constant 0 : index
    %c0_2 = arith.constant 0 : index
    %1 = vector.load %arg3[%c0_1, %c0_2] : memref<1x32xf32, #tpu.memory_space<vmem>>, vector<1x32xf32>
    %2 = vector.extract_strided_slice %0 {offsets = [0, 0], sizes = [64, 1], strides = [1, 1]} : vector<64x2xf32> to vector<64x1xf32>
    %c0_3 = arith.constant 0 : index
    %c0_4 = arith.constant 0 : index
    %3 = vector.load %arg1[%c0_3, %c0_4] : memref<2x32xf32, #tpu.memory_space<vmem>>, vector<1x32xf32>
    %4 = vector.broadcast %2 : vector<64x1xf32> to vector<64x32xf32>
    %5 = vector.broadcast %3 : vector<1x32xf32> to vector<64x32xf32>
    %6 = arith.mulf %4, %5 : vector<64x32xf32>
    %7 = vector.broadcast %1 : vector<1x32xf32> to vector<64x32xf32>
    %8 = arith.addf %7, %6 : vector<64x32xf32>
    %9 = vector.extract_strided_slice %0 {offsets = [0, 1], sizes = [64, 1], strides = [1, 1]} : vector<64x2xf32> to vector<64x1xf32>
    %c1 = arith.constant 1 : index
    %c0_5 = arith.constant 0 : index
    %10 = vector.load %arg1[%c1, %c0_5] : memref<2x32xf32, #tpu.memory_space<vmem>>, vector<1x32xf32>
    %11 = vector.broadcast %9 : vector<64x1xf32> to vector<64x32xf32>
    %12 = vector.broadcast %10 : vector<1x32xf32> to vector<64x32xf32>
    %13 = arith.mulf %11, %12 : vector<64x32xf32>
    %14 = arith.addf %8, %13 : vector<64x32xf32>
    %c0_6 = arith.constant 0 : index
    %c0_7 = arith.constant 0 : index
    %15 = vector.load %arg2[%c0_6, %c0_7] : memref<32x32xf32, #tpu.memory_space<vmem>>, vector<32x32xf32>
    %cst = arith.constant 0.000000e+00 : f32
    %16 = vector.broadcast %cst : f32 to vector<8x32xf32>
    %17 = vector.extract_strided_slice %14 {offsets = [0, 0], sizes = [8, 32], strides = [1, 1]} : vector<64x32xf32> to vector<8x32xf32>
    %cst_8 = arith.constant dense<0.000000e+00> : vector<8x32xf32>
    %18 = tpu.matmul %16, %15, %cst_8 {dimension_numbers = #tpu.dot_dimension_numbers<[1], [0], [0], [1], [0, 0, 1, 1], [], []>} : vector<8x32xf32>, vector<32x32xf32>, vector<8x32xf32> -> vector<8x32xf32>
    %19 = arith.addf %17, %18 : vector<8x32xf32>
    %20 = math.tanh %19 : vector<8x32xf32>
    %21 = vector.extract_strided_slice %14 {offsets = [8, 0], sizes = [8, 32], strides = [1, 1]} : vector<64x32xf32> to vector<8x32xf32>
    %cst_9 = arith.constant dense<0.000000e+00> : vector<8x32xf32>
    %22 = tpu.matmul %20, %15, %cst_9 {dimension_numbers = #tpu.dot_dimension_numbers<[1], [0], [0], [1], [0, 0, 1, 1], [], []>} : vector<8x32xf32>, vector<32x32xf32>, vector<8x32xf32> -> vector<8x32xf32>
    %23 = arith.addf %21, %22 : vector<8x32xf32>
    %24 = math.tanh %23 : vector<8x32xf32>
    %25 = vector.extract_strided_slice %14 {offsets = [16, 0], sizes = [8, 32], strides = [1, 1]} : vector<64x32xf32> to vector<8x32xf32>
    %cst_10 = arith.constant dense<0.000000e+00> : vector<8x32xf32>
    %26 = tpu.matmul %24, %15, %cst_10 {dimension_numbers = #tpu.dot_dimension_numbers<[1], [0], [0], [1], [0, 0, 1, 1], [], []>} : vector<8x32xf32>, vector<32x32xf32>, vector<8x32xf32> -> vector<8x32xf32>
    %27 = arith.addf %25, %26 : vector<8x32xf32>
    %28 = math.tanh %27 : vector<8x32xf32>
    %29 = vector.extract_strided_slice %14 {offsets = [24, 0], sizes = [8, 32], strides = [1, 1]} : vector<64x32xf32> to vector<8x32xf32>
    %cst_11 = arith.constant dense<0.000000e+00> : vector<8x32xf32>
    %30 = tpu.matmul %28, %15, %cst_11 {dimension_numbers = #tpu.dot_dimension_numbers<[1], [0], [0], [1], [0, 0, 1, 1], [], []>} : vector<8x32xf32>, vector<32x32xf32>, vector<8x32xf32> -> vector<8x32xf32>
    %31 = arith.addf %29, %30 : vector<8x32xf32>
    %32 = math.tanh %31 : vector<8x32xf32>
    %33 = vector.extract_strided_slice %14 {offsets = [32, 0], sizes = [8, 32], strides = [1, 1]} : vector<64x32xf32> to vector<8x32xf32>
    %cst_12 = arith.constant dense<0.000000e+00> : vector<8x32xf32>
    %34 = tpu.matmul %32, %15, %cst_12 {dimension_numbers = #tpu.dot_dimension_numbers<[1], [0], [0], [1], [0, 0, 1, 1], [], []>} : vector<8x32xf32>, vector<32x32xf32>, vector<8x32xf32> -> vector<8x32xf32>
    %35 = arith.addf %33, %34 : vector<8x32xf32>
    %36 = math.tanh %35 : vector<8x32xf32>
    %37 = vector.extract_strided_slice %14 {offsets = [40, 0], sizes = [8, 32], strides = [1, 1]} : vector<64x32xf32> to vector<8x32xf32>
    %cst_13 = arith.constant dense<0.000000e+00> : vector<8x32xf32>
    %38 = tpu.matmul %36, %15, %cst_13 {dimension_numbers = #tpu.dot_dimension_numbers<[1], [0], [0], [1], [0, 0, 1, 1], [], []>} : vector<8x32xf32>, vector<32x32xf32>, vector<8x32xf32> -> vector<8x32xf32>
    %39 = arith.addf %37, %38 : vector<8x32xf32>
    %40 = math.tanh %39 : vector<8x32xf32>
    %41 = vector.extract_strided_slice %14 {offsets = [48, 0], sizes = [8, 32], strides = [1, 1]} : vector<64x32xf32> to vector<8x32xf32>
    %cst_14 = arith.constant dense<0.000000e+00> : vector<8x32xf32>
    %42 = tpu.matmul %40, %15, %cst_14 {dimension_numbers = #tpu.dot_dimension_numbers<[1], [0], [0], [1], [0, 0, 1, 1], [], []>} : vector<8x32xf32>, vector<32x32xf32>, vector<8x32xf32> -> vector<8x32xf32>
    %43 = arith.addf %41, %42 : vector<8x32xf32>
    %44 = math.tanh %43 : vector<8x32xf32>
    %45 = vector.extract_strided_slice %14 {offsets = [56, 0], sizes = [8, 32], strides = [1, 1]} : vector<64x32xf32> to vector<8x32xf32>
    %cst_15 = arith.constant dense<0.000000e+00> : vector<8x32xf32>
    %46 = tpu.matmul %44, %15, %cst_15 {dimension_numbers = #tpu.dot_dimension_numbers<[1], [0], [0], [1], [0, 0, 1, 1], [], []>} : vector<8x32xf32>, vector<32x32xf32>, vector<8x32xf32> -> vector<8x32xf32>
    %47 = arith.addf %45, %46 : vector<8x32xf32>
    %48 = math.tanh %47 : vector<8x32xf32>
    %c0_16 = arith.constant 0 : index
    %c0_17 = arith.constant 0 : index
    %49 = vector.load %arg4[%c0_16, %c0_17] : memref<1x32xf32, #tpu.memory_space<vmem>>, vector<1x32xf32>
    %50 = vector.broadcast %49 : vector<1x32xf32> to vector<8x32xf32>
    %51 = arith.mulf %48, %50 : vector<8x32xf32>
    %cst_18 = arith.constant dense<0.000000e+00> : vector<8xf32>
    %52 = vector.multi_reduction <add>, %51, %cst_18 [1] : vector<8x32xf32> to vector<8xf32>
    %53 = vector.shape_cast %52 : vector<8xf32> to vector<8x1xf32>
    %c0_19 = arith.constant 0 : index
    %c0_20 = arith.constant 0 : index
    %54 = vector.load %arg5[%c0_19, %c0_20] : memref<1x1xf32, #tpu.memory_space<vmem>>, vector<1x1xf32>
    %55 = vector.broadcast %54 : vector<1x1xf32> to vector<8x1xf32>
    %56 = arith.addf %53, %55 : vector<8x1xf32>
    %c0_21 = arith.constant 0 : index
    %c0_22 = arith.constant 0 : index
    %57 = vector.load %arg6[%c0_21, %c0_22] : memref<8x1xf32, #tpu.memory_space<vmem>>, vector<8x1xf32>
    tpu.vector_store %arg6[%c0_21, %c0_22], %56 {strides = array<i32>} : memref<8x1xf32, #tpu.memory_space<vmem>>, vector<8x1xf32>,
    return
  }
}

</mosaic_0001>

<bundles_post_ra>
// kernel: rnn_forward.1
= control target key start
LH: loop header
LB: loop body
LE: loop exit
PB: predicated region body
PF: predicated region fallthrough
CT: control target
= control target key end

     0   :  { %v949_v0 = vmov 0.0   ;;  %vm950_vm0 = vmmov 0   ;;  %v951_v3 = vmov 0   ;;  %v952_v8 = vmov 1   ;;  %s1157_s2 = inlined_call_operand.vmem [shape: f32[32,32], index: 2, kind: input, shape index: {}]   ;;  %s1158_s0 = inlined_call_operand.vmem [shape: f32[64,2], index: 0, kind: input, shape index: {}]   ;;  %s1159_s1 = inlined_call_operand.vmem [shape: f32[2,32], index: 1, kind: input, shape index: {}]   ;;  %s1160_s3 = inlined_call_operand.vmem [shape: f32[1,32], index: 3, kind: input, shape index: {}]   ;;  %s1161_s5 = inlined_call_operand.<no memory space> [shape: f32[1,1], index: 5, kind: input, shape index: {}]   ;;  %s1162_s4 = inlined_call_operand.vmem [shape: f32[1,32], index: 4, kind: input, shape index: {}]   ;;  %s1163_s6 = inlined_call_operand.vmem [shape: f32[8,1], index: 6, kind: output, shape index: {}]  }
   0x1   :  { %836 = vmatprep.subr.mxu0 %v949_v0  ;;  %v992_v1 = vld [vmem:[%s1157_s2 + $0x18] sm:$0xff]  ;;  %v997_v2 = vld [vmem:[%s1157_s2 + $0x10] sm:$0xff]  ;;  %844 = vmatprep.mubr.msk.f32.mxu0 %vm950_vm0, %v949_v0  ;;  %v26_v4 = vld [vmem:[%s1158_s0 + $0x8] sm:$0xff]  ;;  %vm158_vm1 = vcmask 261120   ;;  %vm778_vm2 = vcmask 7168  }
   0x2   :  { %837 = vmatpush3.msra.mxu0 %v992_v1  ;;  %930 = vset.pattern.permute.xlu1 %v951_v3  ;;  %v25_v5 = vld [vmem:[%s1158_s0] sm:$0xff]  ;;  %v1012_v6 = vld [vmem:[%s1157_s2 + $0x8] sm:$0xff]  ;;  %v27_v9 = vld [vmem:[%s1158_s0 + $0x10] sm:$0xff] }
   0x3   :  { %838 = vmatprep.subr.mxu0 %v949_v0  ;;  %42 = vperm.xlu1 %930, %v26_v4   ;;  %v1019_v7 = vld [vmem:[%s1157_s2] sm:$0xff]  ;;  %v28_v10 = vld [vmem:[%s1158_s0 + $0x18] sm:$0xff]  ;;  %v30_v12 = vld [vmem:[%s1158_s0 + $0x28] sm:$0xff] }
   0x4   :  { %839 = vmatpush3.msra.mxu0 %v997_v2  ;;  %928 = vset.pattern.permute.xlu0 %v951_v3  ;;  %v29_v11 = vld [vmem:[%s1158_s0 + $0x20] sm:$0xff]  ;;  %v31_v13 = vld [vmem:[%s1158_s0 + $0x30] sm:$0xff]  ;;  %v32_v14 = vld [vmem:[%s1158_s0 + $0x38] sm:$0xff] }
   0x5   :  { %840 = vmatprep.subr.mxu0 %v949_v0  ;;  %37 = vperm.xlu0 %928, %v25_v5   ;;  %v784_v15 = vld [vmem:[%s1159_s1] ss:$0 sm:$0xff]  ;;  %v786_v21 = vld [vmem:[%s1159_s1 + $0x1] ss:$0 sm:$0xff] }
   0x6   :  { %841 = vmatpush3.msra.mxu0 %v1012_v6  ;;  %847 = vmatprep.subr.mxu1 %v949_v0  ;;  %v785_v18 = vld [vmem:[%s1160_s3] ss:$0 sm:$0xff] }
   0x7   :  { %842 = vmatprep.subr.mxu0 %v949_v0  ;;  %931 = vset.pattern.permute.xlu1 %v952_v8 }
   0x8   :  { %843 = vmatpush3.msra.mxu0 %v1019_v7  ;;  %107 = vperm.xlu1 %931, %v26_v4  }
   0x9   :  { %845 = vmatmul.mubr.f32.vlgmr.msra.gmra.mxu0 %v949_v0  ;;  %929 = vset.pattern.permute.xlu0 %v952_v8 }
   0xa   :  { %103 = vperm.xlu0 %929, %v25_v5   ;;  %848 = vmatpush3.msra.mxu1 %v992_v1 }
   0xb   :  { %849 = vmatprep.subr.mxu1 %v949_v0  ;;  %855 = vmatprep.mubr.msk.f32.mxu1 %vm950_vm0, %v949_v0 }
   0xc   :  { %932 = vset.pattern.permute.xlu1 %v951_v3  ;;  %850 = vmatpush3.msra.mxu1 %v997_v2 }
   0xd   :  { %47 = vperm.xlu1 %932, %v27_v9   ;;  %851 = vmatprep.subr.mxu1 %v949_v0 }
   0xe   :  { %111 = vperm.xlu0 %929, %v27_v9   ;;  %852 = vmatpush3.msra.mxu1 %v1012_v6 }
   0xf   :  { %853 = vmatprep.subr.mxu1 %v949_v0  ;;  %858 = vmatprep.subr.mxu0 %v949_v0 }
  0x10   :  { %854 = vmatpush3.msra.mxu1 %v1019_v7  ;;  %859 = vmatpush3.msra.mxu0 %v992_v1 }
  0x11   :  { %52 = vperm.xlu1 %932, %v28_v10   ;;  %860 = vmatprep.subr.mxu0 %v949_v0 }
  0x12   :  { %115 = vperm.xlu0 %929, %v28_v10   ;;  %861 = vmatpush3.msra.mxu0 %v997_v2 }
  0x13   :  { %862 = vmatprep.subr.mxu0 %v949_v0  ;;  %866 = vmatprep.mubr.msk.f32.mxu0 %vm950_vm0, %v949_v0 }
  0x14   :  { %863 = vmatpush3.msra.mxu0 %v1012_v6  ;;  %869 = vmatprep.subr.mxu1 %v949_v0 }
  0x15   :  { %57 = vperm.xlu1 %932, %v29_v11   ;;  %864 = vmatprep.subr.mxu0 %v949_v0 }
  0x16   :  { %119 = vperm.xlu0 %929, %v29_v11   ;;  %865 = vmatpush3.msra.mxu0 %v1019_v7 }
  0x17   :  { %880 = vmatprep.subr.mxu0 %v949_v0 }
  0x19   :  { %62 = vperm.xlu1 %932, %v30_v12  }
  0x1a   :  { %123 = vperm.xlu0 %929, %v30_v12  }
  0x1d   :  { %67 = vperm.xlu1 %932, %v31_v13  }
  0x1e   :  { %127 = vperm.xlu0 %929, %v31_v13  }
  0x21   :  { %72 = vperm.xlu1 %932, %v32_v14  }
  0x22   :  { %131 = vperm.xlu0 %929, %v32_v14  }
  0x7e   :  { %v43_v16 = vpop.permute.xlu1 %42 }
  0x7f   :  { %v80_v17 = vmul.f32 %v784_v15, %v43_v16 }
  0x80   :  { %v38_v19 = vpop.permute.xlu0 %37 }
  0x81   :  { %v94_v20 = vadd.f32 %v785_v18, %v80_v17  ;;  %v79_v62 = vmul.f32 %v784_v15, %v38_v19 }
  0x83   :  { %v108_v22 = vpop.permute.xlu1 %107  ;;  %v93_v63 = vadd.f32 %v785_v18, %v79_v62 }
  0x84   :  { %v139_v23 = vmul.f32 %v786_v21, %v108_v22 }
  0x85   :  { %v104_v24 = vpop.permute.xlu0 %103 }
  0x86   :  { %v147_v25 = vadd.f32 %v139_v23, %v94_v20  ;;  %v138_v3 = vmul.f32 %v786_v21, %v104_v24 }
  0x88   :  { %v48_v26 = vpop.permute.xlu1 %47  ;;  %v146_v4 = vadd.f32 %v138_v3, %v93_v63 }
  0x89   :  { %v81_v27 = vmul.f32 %v784_v15, %v48_v26  ;;  %v112_v28 = vpop.permute.xlu0 %111 }
  0x8a   :  { %v140_v29 = vmul.f32 %v786_v21, %v112_v28 }
  0x8b   :  { %v95_v30 = vadd.f32 %v785_v18, %v81_v27 }
  0x8c   :  { %v53_v31 = vpop.permute.xlu1 %52 }
  0x8d   :  { %v82_v32 = vmul.f32 %v784_v15, %v53_v31  ;;  %v116_v33 = vpop.permute.xlu0 %115  ;;  %v1074_v34 = vadd.f32 %v140_v29, %v95_v30 }
  0x8e   :  { %v141_v35 = vmul.f32 %v786_v21, %v116_v33 }
  0x8f   :  { %v96_v36 = vadd.f32 %v785_v18, %v82_v32 }
  0x90   :  { %v58_v37 = vpop.permute.xlu1 %57 }
  0x91   :  { %v83_v38 = vmul.f32 %v784_v15, %v58_v37  ;;  %v120_v39 = vpop.permute.xlu0 %119  ;;  %v1076_v40 = vadd.f32 %v141_v35, %v96_v36 }
  0x92   :  { %v142_v41 = vmul.f32 %v786_v21, %v120_v39 }
  0x93   :  { %v97_v42 = vadd.f32 %v785_v18, %v83_v38 }
  0x94   :  { %v63_v43 = vpop.permute.xlu1 %62 }
  0x95   :  { %v84_v44 = vmul.f32 %v784_v15, %v63_v43  ;;  %v124_v45 = vpop.permute.xlu0 %123  ;;  %v1078_v46 = vadd.f32 %v142_v41, %v97_v42 }
  0x96   :  { %v143_v47 = vmul.f32 %v786_v21, %v124_v45 }
  0x97   :  { %v98_v48 = vadd.f32 %v785_v18, %v84_v44 }
  0x98   :  { %v68_v49 = vpop.permute.xlu1 %67 }
  0x99   :  { %v85_v50 = vmul.f32 %v784_v15, %v68_v49  ;;  %v128_v51 = vpop.permute.xlu0 %127  ;;  %v1080_v52 = vadd.f32 %v143_v47, %v98_v48 }
  0x9a   :  { %v144_v53 = vmul.f32 %v786_v21, %v128_v51 }
  0x9b   :  { %v99_v54 = vadd.f32 %v785_v18, %v85_v50 }
  0x9c   :  { %v73_v55 = vpop.permute.xlu1 %72 }
  0x9d   :  { %v86_v56 = vmul.f32 %v784_v15, %v73_v55  ;;  %v132_v57 = vpop.permute.xlu0 %131  ;;  %v1082_v58 = vadd.f32 %v144_v53, %v99_v54 }
  0x9e   :  { %v145_v59 = vmul.f32 %v786_v21, %v132_v57 }
  0x9f   :  { %v100_v60 = vadd.f32 %v785_v18, %v86_v56 }
  0xa1   :  { %v1084_v61 = vadd.f32 %v145_v59, %v100_v60 }
  0xc9   :  { %v228_v5 = vpop.f32.mrf.mxu0 }
  0xca   :  { %v232_v8 = vadd.f32 %v228_v5, %v146_v4 }
  0xcb   :  { %v846_v9 = vpop.f32.mrf.mxu0 }
  0xcc   :  { %933 = vtanh.f32 %v232_v8 }
  0xd9   :  { %v934_v10 = vpop.eup %933 }
  0xda   :  { %856 = vmatmul.mubr.msk.f32.vlgmr.msra.gmra.mxu1 %vm158_vm1, %v934_v10 }
  0xdb   :  { %870 = vmatpush3.msra.mxu1 %v992_v1  ;;  %877 = vmatprep.mubr.msk.f32.mxu1 %vm950_vm0, %v949_v0 }
  0xdc   :  { %871 = vmatprep.subr.mxu1 %v949_v0 }
  0xdd   :  { %872 = vmatpush3.msra.mxu1 %v997_v2 }
  0xde   :  { %873 = vmatprep.subr.mxu1 %v949_v0 }
  0xdf   :  { %874 = vmatpush3.msra.mxu1 %v1012_v6 }
  0xe0   :  { %875 = vmatprep.subr.mxu1 %v949_v0 }
  0xe1   :  { %876 = vmatpush3.msra.mxu1 %v1019_v7 }
  0xe2   :  { %891 = vmatprep.subr.mxu1 %v949_v0 }
 0x19a   :  { %v303_v11 = vpop.f32.mrf.mxu1 }
 0x19b   :  { %v307_v12 = vadd.f32 %v303_v11, %v147_v25 }
 0x19c   :  { %v857_v13 = vpop.f32.mrf.mxu1 }
 0x19d   :  { %935 = vtanh.f32 %v307_v12 }
 0x1aa   :  { %v936_v14 = vpop.eup %935 }
 0x1ab   :  { %867 = vmatmul.mubr.msk.f32.vlgmr.msra.gmra.mxu0 %vm158_vm1, %v936_v14 }
 0x1ac   :  { %881 = vmatpush3.msra.mxu0 %v992_v1  ;;  %888 = vmatprep.mubr.msk.f32.mxu0 %vm950_vm0, %v949_v0 }
 0x1ad   :  { %882 = vmatprep.subr.mxu0 %v949_v0 }
 0x1ae   :  { %883 = vmatpush3.msra.mxu0 %v997_v2 }
 0x1af   :  { %884 = vmatprep.subr.mxu0 %v949_v0 }
 0x1b0   :  { %885 = vmatpush3.msra.mxu0 %v1012_v6 }
 0x1b1   :  { %886 = vmatprep.subr.mxu0 %v949_v0 }
 0x1b2   :  { %887 = vmatpush3.msra.mxu0 %v1019_v7 }
 0x1b3   :  { %902 = vmatprep.subr.mxu0 %v949_v0 }
 0x26b   :  { %v378_v15 = vpop.f32.mrf.mxu0 }
 0x26c   :  { %v382_v16 = vadd.f32 %v378_v15, %v1074_v34  ;;  %v794_v34 = vld [vmem:[%s1162_s4] ss:$0 sm:$0xff] }
 0x26d   :  { %v868_v17 = vpop.f32.mrf.mxu0 }
 0x26e   :  { %937 = vtanh.f32 %v382_v16 }
 0x27b   :  { %v938_v18 = vpop.eup %937 }
 0x27c   :  { %878 = vmatmul.mubr.msk.f32.vlgmr.msra.gmra.mxu1 %vm158_vm1, %v938_v18 }
 0x27d   :  { %892 = vmatpush3.msra.mxu1 %v992_v1  ;;  %899 = vmatprep.mubr.msk.f32.mxu1 %vm950_vm0, %v949_v0 }
 0x27e   :  { %893 = vmatprep.subr.mxu1 %v949_v0 }
 0x27f   :  { %894 = vmatpush3.msra.mxu1 %v997_v2 }
 0x280   :  { %895 = vmatprep.subr.mxu1 %v949_v0 }
 0x281   :  { %896 = vmatpush3.msra.mxu1 %v1012_v6 }
 0x282   :  { %897 = vmatprep.subr.mxu1 %v949_v0 }
 0x283   :  { %898 = vmatpush3.msra.mxu1 %v1019_v7 }
 0x284   :  { %913 = vmatprep.subr.mxu1 %v949_v0 }
 0x33c   :  { %v453_v19 = vpop.f32.mrf.mxu1 }
 0x33d   :  { %v457_v20 = vadd.f32 %v453_v19, %v1076_v40 }
 0x33e   :  { %v879_v21 = vpop.f32.mrf.mxu1 }
 0x33f   :  { %939 = vtanh.f32 %v457_v20 }
 0x34c   :  { %v940_v22 = vpop.eup %939 }
 0x34d   :  { %889 = vmatmul.mubr.msk.f32.vlgmr.msra.gmra.mxu0 %vm158_vm1, %v940_v22 }
 0x34e   :  { %903 = vmatpush3.msra.mxu0 %v992_v1  ;;  %910 = vmatprep.mubr.msk.f32.mxu0 %vm950_vm0, %v949_v0 }
 0x34f   :  { %904 = vmatprep.subr.mxu0 %v949_v0 }
 0x350   :  { %905 = vmatpush3.msra.mxu0 %v997_v2 }
 0x351   :  { %906 = vmatprep.subr.mxu0 %v949_v0 }
 0x352   :  { %907 = vmatpush3.msra.mxu0 %v1012_v6 }
 0x353   :  { %908 = vmatprep.subr.mxu0 %v949_v0 }
 0x354   :  { %909 = vmatpush3.msra.mxu0 %v1019_v7 }
 0x40d   :  { %v528_v23 = vpop.f32.mrf.mxu0 }
 0x40e   :  { %v532_v24 = vadd.f32 %v528_v23, %v1078_v46 }
 0x40f   :  { %v890_v25 = vpop.f32.mrf.mxu0 }
 0x410   :  { %941 = vtanh.f32 %v532_v24 }
 0x41d   :  { %v942_v26 = vpop.eup %941 }
 0x41e   :  { %900 = vmatmul.mubr.msk.f32.vlgmr.msra.gmra.mxu1 %vm158_vm1, %v942_v26 }
 0x41f   :  { %914 = vmatpush3.msra.mxu1 %v992_v1  ;;  %921 = vmatprep.mubr.msk.f32.mxu1 %vm950_vm0, %v949_v0 }
 0x420   :  { %915 = vmatprep.subr.mxu1 %v949_v0 }
 0x421   :  { %916 = vmatpush3.msra.mxu1 %v997_v2 }
 0x422   :  { %917 = vmatprep.subr.mxu1 %v949_v0 }
 0x423   :  { %918 = vmatpush3.msra.mxu1 %v1012_v6 }
 0x424   :  { %919 = vmatprep.subr.mxu1 %v949_v0  ;;  %v11_v0 = vstv %s1161_s5 }
 0x425   :  { %920 = vmatpush3.msra.mxu1 %v1019_v7  ;;  %12 = vst [vmem:[#allocation2] sm:$0x1] %v11_v0 }
 0x42c   :  { %v795_v38 = vld [vmem:[#allocation2] ss:$0 sm:$0xff] }
 0x4de   :  { %v603_v27 = vpop.f32.mrf.mxu1 }
 0x4df   :  { %v607_v28 = vadd.f32 %v603_v27, %v1080_v52 }
 0x4e0   :  { %v901_v29 = vpop.f32.mrf.mxu1 }
 0x4e1   :  { %943 = vtanh.f32 %v607_v28 }
 0x4ee   :  { %v944_v1 = vpop.eup %943 }
 0x4ef   :  { %911 = vmatmul.mubr.msk.f32.vlgmr.msra.gmra.mxu0 %vm158_vm1, %v944_v1 }
 0x5af   :  { %v678_v30 = vpop.f32.mrf.mxu0 }
 0x5b0   :  { %v682_v31 = vadd.f32 %v678_v30, %v1082_v58 }
 0x5b1   :  { %v912_v2 = vpop.f32.mrf.mxu0 }
 0x5b2   :  { %945 = vtanh.f32 %v682_v31 }
 0x5bf   :  { %v946_v32 = vpop.eup %945 }
 0x5c0   :  { %922 = vmatmul.mubr.msk.f32.vlgmr.msra.gmra.mxu1 %vm158_vm1, %v946_v32 }
 0x680   :  { %v753_v6 = vpop.f32.mrf.mxu1 }
 0x681   :  { %v757_v7 = vadd.f32 %v753_v6, %v1084_v61 }
 0x682   :  { %v923_v33 = vpop.f32.mrf.mxu1 }
 0x683   :  { %947 = vtanh.f32 %v757_v7 }
 0x690   :  { %v948_v35 = vpop.eup %947 }
 0x691   :  { %v766_v36 = vmul.f32 %v948_v35, %v794_v34 }
 0x693   :  { %v767_v37 = vsel %vm158_vm1, %v766_v36, 0.0 }
 0x694   :  { %768 = vadd.xlane.f32.xlu1 %v767_v37 }
 0x71d   :  { %v769_v39 = vpop.xlane.xlu1 %768 }
 0x71e   :  { %v777_v40 = vadd.f32 %v795_v38, %v769_v39 }
 0x720   :  { %779 = vst.msk [vmem:[%s1163_s6] sm:$0xff] %vm778_vm2, %v777_v40 }

</bundles_post_ra>
